<compile_context>
chip_gen: v7x
topology: tpu7x:2x2x1
jax: 0.10.0
libtpu: 0.0.40
codegen_flags: <defaults>
</compile_context>

<pallas_src>
import functools

import jax
import jax.numpy as jnp
from jax import lax
from jax.experimental import pallas as pl
from jax.experimental.pallas import tpu as pltpu


_LANE = 128
_SUBLANE = 8
_TARGET_TILE_BYTES = 2 * 1024 * 1024     # aim for >= 2 MiB moved per grid step
_FALLBACK_VMEM_BYTES = 64 * 1024 * 1024  # conservative (v7x) if hw query fails


def _round_up(v: int, m: int) -> int:
    return (v + m - 1) // m * m


def _vmem_capacity_bytes() -> int:
    try:
        return int(pltpu.get_tpu_info().vmem_capacity_bytes)
    except Exception:
        return _FALLBACK_VMEM_BYTES


# ----------------------------------------------------------------------------
# Pallas kernel: batched projection onto the L2 ball of radius r.
# ----------------------------------------------------------------------------
def _l2_projection_kernel(x_ref, o_ref, *, radius: float):
    # x_ref / o_ref: (TB, N) VMEM tiles in the native dtype.
    x = x_ref[...]
    xf = x.astype(jnp.float32)
    # Per-row squared norm, f32 accumulation (lane-axis reduction -> XLU).
    sq_norm = jnp.sum(xf * xf, axis=-1, keepdims=True)            # (TB, 1) f32
    r = jnp.float32(radius)
    r2 = jnp.float32(radius * radius)
    # scale = min(1, r/||x||) via squared compare + rsqrt (EUP); the zero-vector
    # guard on the squared norm keeps rsqrt finite (the where picks 1.0 there).
    inv_norm = lax.rsqrt(jnp.maximum(sq_norm, jnp.float32(1e-24)))
    scale = jnp.where(sq_norm > r2, r * inv_norm, jnp.float32(1.0))
    # Multiply on the native-dtype tile (no tile-wide f32 copy of x for bf16).
    o_ref[...] = (x * scale.astype(x.dtype)).astype(o_ref.dtype)


def l2_ball_projection(x2d: jax.Array, radius: float) -> jax.Array:
    """x2d: (B, N). Returns the projection of each row onto {||u||_2 <= radius}."""
    B, N = x2d.shape
    dtype = x2d.dtype
    itemsize = jnp.dtype(dtype).itemsize
    row_bytes = max(N, 1) * itemsize

    # Generation-aware VMEM budgeting: double-buffered (in + out) = 4 tiles resident.
    vmem_capacity = _vmem_capacity_bytes()
    vmem_limit = (vmem_capacity * 3) // 4          # ~48 MiB on v7x, ~96 MiB on v5e/v6e
    per_buf_budget = (vmem_capacity // 2) // 4     # bytes per single tile buffer

    # Rows needed to hit the target tile size (round up to a sublane multiple).
    tb_target = _round_up(max(1, -(-_TARGET_TILE_BYTES // row_bytes)), _SUBLANE)
    # Rows that fit the per-buffer VMEM budget (round down, floor at 8).
    tb_budget = max(_SUBLANE, (per_buf_budget // row_bytes) // _SUBLANE * _SUBLANE)
    # Keep >= 2 grid steps when the batch allows, so v7x can use both TensorCores.
    tb_split = _round_up(max(1, -(-B // 2)), _SUBLANE)

    tb = max(_SUBLANE, min(tb_target, tb_budget, tb_split))

    grid = (pl.cdiv(B, tb),)
    kernel = functools.partial(_l2_projection_kernel, radius=float(radius))

    # Feature block == full array width N (legal even when N % 128 != 0); batch
    # block tb is a multiple of 8; the last batch block may be partial (masked).
    out = pl.pallas_call(
        kernel,
        out_shape=jax.ShapeDtypeStruct((B, N), dtype),
        grid=grid,
        in_specs=[pl.BlockSpec((tb, N), lambda i: (i, 0))],
        out_specs=pl.BlockSpec((tb, N), lambda i: (i, 0)),
        compiler_params=pltpu.CompilerParams(
            dimension_semantics=("parallel",),
            vmem_limit_bytes=vmem_limit,
        ),
    )(x2d)
    return out


# ----------------------------------------------------------------------------
# Declarative node + generic DeclarativeLayer (JAX mirror of the PyTorch classes)
# ----------------------------------------------------------------------------
class EuclideanProjectionProblem:
    """Concrete *DeclarativeNode*: projection onto the L2 ball of radius r."""

    def __init__(self, radius: float = 1.0):
        self.radius = float(radius)

    def solve(self, x):
        # x: (b, ...) -> flatten trailing dims (glue); native dtype streams through
        # the Pallas kernel (no extra HBM copies in the wrapper).
        b = x.shape[0]
        x2d = x.reshape(b, -1)
        y2d = l2_ball_projection(x2d, self.radius)
        y = y2d.reshape(x.shape)
        return y, None  # (output, solve_ctx)


class DeclarativeLayer:
    """Generic declarative layer (forward semantics of the PyTorch DeclarativeLayer).

    forward(*inputs) -> problem.solve(*inputs)[0]
    (JAX arrays are immutable, so the torch `.clone()` is unnecessary and omitted.)
    """

    def __init__(self, problem):
        self.problem = problem

    def __call__(self, *inputs):
        output, _solve_ctx = self.problem.solve(*inputs)
        return output


# ----------------------------------------------------------------------------
# Demo / self-check
# ----------------------------------------------------------------------------
if __name__ == "__main__":
    key = jax.random.PRNGKey(0)
    # Small shapes consistent with the (b, ...) assumption of the module.
    x = 3.0 * jax.random.normal(key, (2, 4, 16, 16), dtype=jnp.float32)

    radius = 1.0
    problem = EuclideanProjectionProblem(radius=radius)
    layer = DeclarativeLayer(problem)

    y = layer(x)
    y = jax.block_until_ready(y)

    # Reference check in plain JAX.
    x2d = x.reshape(x.shape[0], -1)
    norms = jnp.linalg.norm(x2d, axis=-1, keepdims=True)
    scale = jnp.where(norms > radius, radius / norms, 1.0)
    y_ref = (x2d * scale).reshape(x.shape)

    assert y.shape == x.shape and y.dtype == x.dtype
    assert jnp.allclose(y, y_ref, atol=1e-5, rtol=1e-5), "mismatch vs reference"
    # Projected rows must lie inside the ball (up to numerical tolerance; rsqrt can
    # exceed r/||x|| by a few ulps, so the invariant is not bit-exact).
    assert bool(
        jnp.all(jnp.linalg.norm(y.reshape(x.shape[0], -1), axis=-1) <= radius + 1e-4)
    )

    print("KERNEL_OK")
</pallas_src>

<mosaic_0001>
module attributes {stable_mosaic.version = 11 : i64} {
  func.func @_l2_projection_kernel(%arg0: i32, %arg1: memref<8x1024xf32, #tpu.memory_space<vmem>>, %arg2: memref<8x1024xf32, #tpu.memory_space<vmem>>) attributes {dimension_semantics = [#tpu.dimension_semantics<parallel>], iteration_bounds = array<i64: 1>, scalar_prefetch = 0 : i64, scratch_operands = 0 : i64, tpu.core_type = #tpu.core_type<tc>, window_params = [{transform_indices = @transform_0, window_bounds = array<i64: 8, 1024>}, {transform_indices = @transform_1, window_bounds = array<i64: 8, 1024>}]} {
    %c0 = arith.constant 0 : index
    %c0_0 = arith.constant 0 : index
    %0 = vector.load %arg1[%c0, %c0_0] : memref<8x1024xf32, #tpu.memory_space<vmem>>, vector<8x1024xf32>
    %1 = arith.mulf %0, %0 : vector<8x1024xf32>
    %cst = arith.constant dense<0.000000e+00> : vector<8xf32>
    %2 = vector.multi_reduction <add>, %1, %cst [1] : vector<8x1024xf32> to vector<8xf32>
    %3 = vector.shape_cast %2 : vector<8xf32> to vector<8x1xf32>
    %cst_1 = arith.constant 1.000000e-24 : f32
    %4 = vector.broadcast %cst_1 : f32 to vector<8x1xf32>
    %5 = arith.maximumf %3, %4 : vector<8x1xf32>
    %6 = math.rsqrt %5 : vector<8x1xf32>
    %cst_2 = arith.constant 1.000000e+00 : f32
    %7 = vector.broadcast %cst_2 : f32 to vector<8x1xf32>
    %8 = arith.cmpf ogt, %3, %7 : vector<8x1xf32>
    %cst_3 = arith.constant 1.000000e+00 : f32
    %9 = vector.broadcast %cst_3 : f32 to vector<8x1xf32>
    %10 = arith.mulf %9, %6 : vector<8x1xf32>
    %cst_4 = arith.constant 1.000000e+00 : f32
    %11 = vector.broadcast %cst_4 : f32 to vector<8x1xf32>
    %12 = arith.select %8, %10, %11 : vector<8x1xi1>, vector<8x1xf32>
    %13 = vector.broadcast %12 : vector<8x1xf32> to vector<8x1024xf32>
    %14 = arith.mulf %0, %13 : vector<8x1024xf32>
    %c0_5 = arith.constant 0 : index
    %c0_6 = arith.constant 0 : index
    %15 = vector.load %arg2[%c0_5, %c0_6] : memref<8x1024xf32, #tpu.memory_space<vmem>>, vector<8x1024xf32>
    tpu.vector_store %arg2[%c0_5, %c0_6], %14 {strides = array<i32>} : memref<8x1024xf32, #tpu.memory_space<vmem>>, vector<8x1024xf32>,
    return
  }
  func.func @transform_0(%arg0: i32) -> (i32, i32) {
    %c0_i32 = arith.constant 0 : i32
    %c0_i32_0 = arith.constant 0 : i32
    return %arg0, %c0_i32 : i32, i32
  }
  func.func @transform_1(%arg0: i32) -> (i32, i32) {
    %c0_i32 = arith.constant 0 : i32
    %c0_i32_0 = arith.constant 0 : i32
    return %arg0, %c0_i32 : i32, i32
  }
}

</mosaic_0001>

<bundles_post_ra>
// kernel: tpu_custom_call.1
= control target key start
LH: loop header
LB: loop body
LE: loop exit
PB: predicated region body
PF: predicated region fallthrough
CT: control target
= control target key end

     0   :  { %6 = vsyncpa [#allocation3], 0  ;;  %s361_s0 = inlined_call_operand.hbm [shape: f32[2,1024], index: 0, kind: input, shape index: {}]   ;;  %s362_s1 = inlined_call_operand.hbm [shape: f32[2,1024], index: 1, kind: output, shape index: {}]  }
   0x1   :  { %7 = vsyncpa [#allocation4], 0 }
   0x2   :  { %12 = vsyncadd [#allocation3], 768  ;;  %s265_s6 = smov [#allocation2]   ;;  %s217_s10 = scalar_lea.hbm %s361_s0, 256 }
   0x3   :  { %s13_s7 = sshll.u32 %s265_s6, 4  ;;  %p218_p0 = scmp.ne.s32.totalorder %s361_s0, %s217_s10  ;;  %s14_s7 = int_to_ptr.vmem [resolvable:$true] %s13_s7 }
   0x4   :  { %p221_p1 = scmp.lt.u32.totalorder %s217_s10, %s361_s0 }
   0x6   :  { %p223_p2 = pnand %p221_p1, %p218_p0 }
   0x8   :  { %226 = shalt.err (!%p223_p2)
}
   0x9   :  { %s227_s15 = scalar_lea.vmem %s14_s7, 256  ;;  %s231_s16 = scalar_lea.vmem %s14_s7, 1024 }
   0xa   :  { %p228_p3 = scmp.ne.s32.totalorder %s14_s7, %s227_s15  ;;  %p232_p4 = scmp.lt.s32.totalorder %s14_s7, %s14_s7 }
   0xb   :  { %p233_p5 = scmp.lt.s32.totalorder %s231_s16, %s227_s15 }
   0xd   :  { %p234_p6 = por %p233_p5, %p232_p4 }
   0xf   :  { %p235_p7 = pnand %p234_p6, %p228_p3 }
  0x11   :  { %238 = shalt.err (!%p235_p7)
}
  0x12   :  { %s266_s17 = smov 256   ;;  %s267_s18 = smov 16  }
  0x13   :  { %19 = dma.hbm_to_vmem [thread:$0]  %s361_s0, 256, %s14_s7, [#allocation3], %s266_s17, %s266_s17, %s267_s18  }
  0x14   :  { %261 = dma.done.wait [#allocation3], 1024  }
  0x15   :  { %262 = vsyncadd [#allocation3], 4294966272  ;;  %v54_v0 = vlaneseq  ;;  %v268_v1 = vmov 1983009808   ;;  %v301_v5 = vld [vmem:[#allocation2] sm:$0xff]  ;;  %v303_v6 = vld [vmem:[#allocation2 + $0x8] sm:$0xff] }
  0x16   :  { %v52_v2 = vunpack.c.l.s4 %v268_v1  ;;  %v305_v7 = vld [vmem:[#allocation2 + $0x10] sm:$0xff]  ;;  %v307_v8 = vld [vmem:[#allocation2 + $0x18] sm:$0xff]  ;;  %v309_v9 = vld [vmem:[#allocation2 + $0x20] sm:$0xff]  ;;  %v31_v11 = vmul.f32 %v301_v5, %v301_v5  ;;  %v32_v12 = vmul.f32 %v303_v6, %v303_v6  ;;  %v269_v55 = vmov 269488144  }
  0x17   :  { %v299_v4 = vshrl.u32 %v54_v0, 7  ;;  %v311_v10 = vld [vmem:[#allocation2 + $0x28] sm:$0xff]  ;;  %v33_v13 = vmul.f32 %v305_v7, %v305_v7  ;;  %v320_v15 = vld [vmem:[#allocation2 + $0x30] sm:$0xff]  ;;  %v322_v16 = vld [vmem:[#allocation2 + $0x38] sm:$0xff]  ;;  %v34_v17 = vmul.f32 %v307_v8, %v307_v8  ;;  %v35_v18 = vmul.f32 %v309_v9, %v309_v9 }
  0x18   :  { %v53_v3 = vunpack.c.0.s8 %v52_v2  ;;  %v36_v19 = vmul.f32 %v311_v10, %v311_v10  ;;  %v37_v20 = vmul.f32 %v320_v15, %v320_v15  ;;  %v38_v21 = vmul.f32 %v322_v16, %v322_v16 }
  0x19   :  { %v47_v22 = vcombine.low %v31_v11, %v33_v13  ;;  %v48_v23 = vcombine.high %v31_v11, %v33_v13  ;;  %v83_v24 = vcombine.low %v32_v12, %v34_v17  ;;  %v84_v32 = vcombine.high %v32_v12, %v34_v17 }
  0x1a   :  { %v56_v14 = vsub.s32 %v53_v3, %v299_v4  ;;  %v49_v25 = vcombine.low %v35_v18, %v37_v20  ;;  %v50_v26 = vcombine.high %v35_v18, %v37_v20  ;;  %v85_v29 = vcombine.low %v36_v19, %v38_v21 }
  0x1b   :  { %v86_v33 = vcombine.high %v36_v19, %v38_v21  ;;  %v142_v56 = vunpack.c.l.s4 %v269_v55  ;;  %v270_v57 = vmov 842150450   ;;  %v271_v59 = vmov 1414812756  }
  0x1c   :  { %v57_v27 = vrot.slane %v47_v22, %v56_v14  ;;  %v64_v28 = vrot.slane %v48_v23, %v56_v14  ;;  %v71_v30 = vrot.slane %v49_v25, %v56_v14  ;;  %v78_v31 = vrot.slane %v50_v26, %v56_v14 }
  0x1d   :  { %v93_v34 = vrot.slane %v83_v24, %v56_v14  ;;  %v107_v38 = vrot.slane %v85_v29, %v56_v14  ;;  %v100_v41 = vrot.slane %v84_v32, %v56_v14  ;;  %v114_v42 = vrot.slane %v86_v33, %v56_v14 }
  0x1e   :  { %v79_v35 = vcombine.low %v57_v27, %v71_v30  ;;  %v80_v36 = vcombine.high %v57_v27, %v71_v30  ;;  %v81_v37 = vcombine.low %v64_v28, %v78_v31  ;;  %v82_v39 = vcombine.high %v64_v28, %v78_v31 }
  0x1f   :  { %v115_v43 = vcombine.low %v93_v34, %v107_v38  ;;  %v116_v45 = vcombine.high %v93_v34, %v107_v38  ;;  %v117_v47 = vcombine.low %v100_v41, %v114_v42  ;;  %v118_v49 = vcombine.high %v100_v41, %v114_v42 }
  0x20   :  { %v127_v40 = vadd.f32 %v80_v36, %v79_v35  ;;  %v149_v58 = vunpack.c.l.s4 %v270_v57  ;;  %v156_v60 = vunpack.c.l.s4 %v271_v59  ;;  %v272_v61 = vmov 1987475062  }
  0x21   :  { %v163_v62 = vunpack.c.l.s4 %v272_v61  ;;  %v143_v63 = vunpack.c.0.s8 %v142_v56 }
  0x22   :  { %v128_v44 = vadd.f32 %v127_v40, %v81_v37  ;;  %v150_v0 = vunpack.c.0.s8 %v149_v58  ;;  %v157_v1 = vunpack.c.0.s8 %v156_v60 }
  0x23   :  { %v164_v2 = vunpack.c.0.s8 %v163_v62  ;;  %v146_v3 = vsub.s32 %v143_v63, %v299_v4 }
  0x24   :  { %v129_v46 = vadd.f32 %v128_v44, %v82_v39  ;;  %v153_v11 = vsub.s32 %v150_v0, %v299_v4  ;;  %v160_v12 = vsub.s32 %v157_v1, %v299_v4 }
  0x25   :  { %v167_v13 = vsub.s32 %v164_v2, %v299_v4 }
  0x26   :  { %v130_v48 = vadd.f32 %v129_v46, %v115_v43 }
  0x28   :  { %v131_v50 = vadd.f32 %v130_v48, %v116_v45 }
  0x2a   :  { %v132_v51 = vadd.f32 %v131_v50, %v117_v47 }
  0x2c   :  { %v133_v52 = vadd.f32 %v132_v51, %v118_v49 }
  0x2e   :  { %134 = vadd.xlane.f32.xlu0 %v133_v52 }
  0xbb   :  { %v135_v53 = vpop.xlane.xlu0 %134 }
  0xbc   :  { %v136_v54 = vmax.f32 %v135_v53, 1e-24  ;;  %vm138_vm0 = vcmp.gt.f32.partialorder %v135_v53, 1.0 }
  0xbe   :  { %215 = vrsqrt.f32 %v136_v54 }
  0xc8   :  { %v216_v14 = vpop.eup %215 }
  0xc9   :  { %v139_v17 = vsel %vm138_vm0, %v216_v14, 1.0 }
  0xca   :  { %v147_v18 = vrot.slane %v139_v17, %v146_v3  ;;  %v154_v19 = vrot.slane %v139_v17, %v153_v11  ;;  %v161_v20 = vrot.slane %v139_v17, %v160_v12  ;;  %v168_v21 = vrot.slane %v139_v17, %v167_v13 }
  0xcc   :  { %v173_v22 = vmul.f32 %v147_v18, %v301_v5  ;;  %v174_v23 = vmul.f32 %v147_v18, %v303_v6  ;;  %v175_v24 = vmul.f32 %v154_v19, %v305_v7  ;;  %v176_v25 = vmul.f32 %v154_v19, %v307_v8 }
  0xcd   :  { %v177_v26 = vmul.f32 %v161_v20, %v309_v9  ;;  %v178_v27 = vmul.f32 %v161_v20, %v311_v10  ;;  %v179_v4 = vmul.f32 %v168_v21, %v320_v15  ;;  %v180_v28 = vmul.f32 %v168_v21, %v322_v16 }
  0xce   :  { %181 = vst [vmem:[#allocation5] sm:$0xff] %v173_v22  ;;  %182 = vst [vmem:[#allocation5 + $0x8] sm:$0xff] %v174_v23 }
  0xcf   :  { %183 = vst [vmem:[#allocation5 + $0x10] sm:$0xff] %v175_v24  ;;  %184 = vst [vmem:[#allocation5 + $0x18] sm:$0xff] %v176_v25 }
  0xd0   :  { %185 = vst [vmem:[#allocation5 + $0x20] sm:$0xff] %v177_v26  ;;  %186 = vst [vmem:[#allocation5 + $0x28] sm:$0xff] %v178_v27 }
  0xd1   :  { %187 = vst [vmem:[#allocation5 + $0x30] sm:$0xff] %v179_v4  ;;  %188 = vst [vmem:[#allocation5 + $0x38] sm:$0xff] %v180_v28 }
  0xd2   :  { %193 = vsyncadd [#allocation4], 768  ;;  %s273_s0 = smov [#allocation5]  }
  0xd3   :  { %s194_s21 = sshll.u32 %s273_s0, 4  ;;  %s195_s21 = int_to_ptr.vmem [resolvable:$true] %s194_s21 }
  0xd4   :  { %s239_s22 = scalar_lea.vmem %s195_s21, 256  ;;  %s243_s23 = scalar_lea.vmem %s195_s21, 1024 }
  0xd5   :  { %p240_p8 = scmp.ne.s32.totalorder %s195_s21, %s239_s22  ;;  %p244_p9 = scmp.lt.s32.totalorder %s195_s21, %s195_s21 }
  0xd6   :  { %p245_p10 = scmp.lt.s32.totalorder %s243_s23, %s239_s22 }
  0xd8   :  { %p246_p11 = por %p245_p10, %p244_p9 }
  0xda   :  { %p247_p12 = pnand %p246_p11, %p240_p8 }
  0xdc   :  { %250 = shalt.err (!%p247_p12)
}
  0xdd   :  { %s251_s26 = scalar_lea.hbm %s362_s1, 256 }
  0xde   :  { %p252_p13 = scmp.ne.s32.totalorder %s362_s1, %s251_s26  ;;  %p255_p0 = scmp.lt.u32.totalorder %s251_s26, %s362_s1 }
  0xe0   :  { %p257_p1 = pnand %p255_p0, %p252_p13 }
  0xe2   :  { %260 = shalt.err (!%p257_p1)
}
  0xe3   :  { %200 = dma.vmem_to_hbm [thread:$0]  %s195_s21, 256, %s362_s1, [#allocation4], %s266_s17, %s266_s17, %s267_s18  }
  0xe4   :  { %263 = dma.done.wait [#allocation4], 1024  }
  0xe5   :  { %264 = vsyncadd [#allocation4], 4294966272 }
  0xe6   :  { %204 = vsyncpa [#allocation3], 1 }
  0xe7   :  { %205 = vsyncpa [#allocation4], 1 }

</bundles_post_ra>
